<compile_context>
chip_gen: v5e
topology: v5e:2x2
jax: 0.10.0
libtpu: 0.0.40
codegen_flags: <defaults>
</compile_context>

<pallas_src>
import functools

import jax
import jax.numpy as jnp
import numpy as np
from jax.experimental import pallas as pl
from jax.experimental.pallas import tpu as pltpu


def _mha_kernel(q_ref, k_ref, v_ref, mask_ref, wq_ref, wo_ref, gamma_ref, beta_ref,
                out_ref, score_ref):
    n_head, head_dim, ks = k_ref.shape[1], k_ref.shape[2], k_ref.shape[3]
    H = n_head * head_dim

    # --- query projection (f32 accumulation); residual uses the *unscaled* query ---
    query = jnp.dot(q_ref[0], wq_ref[...],
                    preferred_element_type=jnp.float32)             # (TQ, H) f32
    tq = query.shape[0]

    # head-major query (the 1/sqrt(d) scale is already folded into the K slab)
    q_h = jnp.transpose(query.reshape(tq, n_head, head_dim),
                        (1, 0, 2)).astype(jnp.bfloat16)             # (h, TQ, d)

    # --- scores: one batched MXU call; K slab is (h, d, Ks) -> lane-dense, no relayout
    s = jnp.einsum('hqd,hdk->hqk', q_h, k_ref[0],
                   preferred_element_type=jnp.float32)              # (h, TQ, Ks) f32
    mask_bool = mask_ref[0] != 0                                    # (TQ, Ks)
    s = jnp.where(mask_bool[None, :, :], jnp.float32(-60000.0), s)
    score_ref[0] = s.astype(score_ref.dtype)                        # bf16, lane-dense

    # --- softmax with deferred normalization ---------------------------------------
    s_max = jnp.max(s, axis=-1, keepdims=True)
    p = jnp.exp(s - s_max)                                          # (h, TQ, Ks) f32
    denom = jnp.sum(p, axis=-1, keepdims=True)                      # (h, TQ, 1) f32

    # unnormalized weighted sum of values, then a single small normalize multiply
    attn = jnp.einsum('hqk,hkd->hqd', p.astype(jnp.bfloat16), v_ref[0],
                      preferred_element_type=jnp.float32)           # (h, TQ, d) f32
    attn = attn * pl.reciprocal(denom, approx=True)
    attn = jnp.transpose(attn, (1, 0, 2)).reshape(tq, H)            # (TQ, H)

    # --- output projection + residual + post LayerNorm (f32) ------------------------
    o = jnp.dot(attn.astype(jnp.bfloat16), wo_ref[...],
                preferred_element_type=jnp.float32)                 # (TQ, hidden)
    o = o + query
    mean = jnp.mean(o, axis=-1, keepdims=True)
    var = jnp.mean((o - mean) ** 2, axis=-1, keepdims=True)
    o = (o - mean) * jax.lax.rsqrt(var + 1e-5)
    out_ref[0] = o * gamma_ref[...] + beta_ref[...]


def _vmem_capacity_bytes():
    """Per-core VMEM capacity; conservative fallback (v7x = 64 MiB) if unqueryable."""
    try:
        info = pltpu.get_tpu_info()
        cap = getattr(info, "vmem_capacity_bytes", None)
        if cap:
            return int(cap)
    except Exception:
        pass
    return 64 * 1024 * 1024


def _pick_block_q(qs, ks, hidden, n_head, head_dim, budget_bytes):
    """Largest q-tile whose estimated (double-buffered) VMEM footprint fits the budget."""
    H = n_head * head_dim
    # block_q-independent residents: K/V slabs (bf16, 2 bufs each), weights, norm params
    fixed = 2 * 2 * (n_head * head_dim * ks * 2)      # K + V slabs
    fixed += 2 * 2 * hidden * H * 2                   # Wq + Wo (bf16)
    fixed += 2 * 2 * (hidden * 4)                     # gamma + beta (f32, tiny)

    cands = [c for c in (1024, 512, 256, 128, 64, 32, 16, 8) if qs % c == 0]
    cands.append(qs)                                  # full extent is always legal
    cands = sorted(set(cands), reverse=True)

    for bq in cands:
        per_tile = 2 * bq * hidden * 2                # q tile (bf16)
        per_tile += 2 * bq * ks * 1                   # mask tile (int8)
        per_tile += 2 * bq * hidden * 4               # out tile (f32)
        per_tile += 2 * n_head * bq * ks * 2          # score tile (bf16)
        per_tile += 3 * n_head * bq * ks * 4          # in-kernel f32 s / exp temporaries
        per_tile += 3 * bq * H * 4                    # query / attn f32 temporaries
        if fixed + per_tile <= budget_bytes:
            return bq
    return min(cands)


@functools.partial(jax.jit, static_argnames=("n_head", "block_q", "vmem_limit"))
def _multihead_att_jit(q, kv, mask, wq_t, wkv_t, wo_t, gamma, beta, *,
                       n_head, block_q, vmem_limit):
    bs, qs, hidden = q.shape
    ks = kv.shape[1]
    H = wq_t.shape[1]
    head_dim = H // n_head
    num_q = qs // block_q
    scale = 1.0 / head_dim ** 0.5

    # bf16 MXU inputs (accumulation stays f32 everywhere).
    q_b = q.astype(jnp.bfloat16)
    kv_b = kv.astype(jnp.bfloat16)
    wq_b = wq_t.astype(jnp.bfloat16)
    wkv_b = wkv_t.astype(jnp.bfloat16)
    wo_b = wo_t.astype(jnp.bfloat16)
    mask_i8 = (mask != 0).astype(jnp.int8)            # preserves mask.bool() semantics

    # --- KV projection + head-major K/V slab build, hoisted out of the kernel --------
    kvp = jnp.dot(kv_b, wkv_b, preferred_element_type=jnp.float32)    # (B, Ks, 2H) f32
    key = kvp[..., :H].reshape(bs, ks, n_head, head_dim)
    value = kvp[..., H:].reshape(bs, ks, n_head, head_dim)
    # fold 1/sqrt(d) into K once; K slab laid out (B, h, d, Ks) -> lane-dense score matmul
    k_slab = (jnp.transpose(key, (0, 2, 3, 1)) * scale).astype(jnp.bfloat16)
    v_slab = jnp.transpose(value, (0, 2, 1, 3)).astype(jnp.bfloat16)  # (B, h, Ks, d)

    out_shape = (
        jax.ShapeDtypeStruct((bs, qs, hidden), jnp.float32),          # out
        jax.ShapeDtypeStruct((bs, n_head, qs, ks), jnp.bfloat16),     # score (lane-dense)
    )

    grid_spec = pltpu.PrefetchScalarGridSpec(
        num_scalar_prefetch=0,
        grid=(bs, num_q),
        in_specs=[
            pl.BlockSpec((1, block_q, hidden), lambda b, i: (b, i, 0)),          # q tile
            pl.BlockSpec((1, n_head, head_dim, ks), lambda b, i: (b, 0, 0, 0)),  # K slab
            pl.BlockSpec((1, n_head, ks, head_dim), lambda b, i: (b, 0, 0, 0)),  # V slab
            pl.BlockSpec((1, block_q, ks), lambda b, i: (b, i, 0)),              # mask
            pl.BlockSpec((hidden, H), lambda b, i: (0, 0)),                      # Wq
            pl.BlockSpec((H, hidden), lambda b, i: (0, 0)),                      # Wo
            pl.BlockSpec((1, hidden), lambda b, i: (0, 0)),                      # gamma
            pl.BlockSpec((1, hidden), lambda b, i: (0, 0)),                      # beta
        ],
        out_specs=[
            pl.BlockSpec((1, block_q, hidden), lambda b, i: (b, i, 0)),
            pl.BlockSpec((1, n_head, block_q, ks), lambda b, i: (b, 0, i, 0)),
        ],
    )

    out, score_hqk = pl.pallas_call(
        _mha_kernel,
        out_shape=out_shape,
        grid_spec=grid_spec,
        compiler_params=pltpu.CompilerParams(
            dimension_semantics=("parallel", "parallel"),
            vmem_limit_bytes=vmem_limit,
        ),
    )(q_b, k_slab, v_slab, mask_i8, wq_b, wo_b, gamma, beta)

    # Module layout for att_prob is (B, Qs, Ks, n_head); transpose + upcast outside.
    att_score = jnp.transpose(score_hqk, (0, 2, 3, 1)).astype(jnp.float32)
    return out, kvp, att_score


def multihead_att(q, kv, mask, wq_t, wkv_t, wo_t, gamma, beta, *, n_head):
    bs, qs, hidden = q.shape
    ks = kv.shape[1]
    H = wq_t.shape[1]
    head_dim = H // n_head
    assert H == n_head * head_dim
    assert wkv_t.shape == (hidden, 2 * H)
    assert wo_t.shape == (H, hidden)
    # The module's residual `out + query` only typechecks when hidden == n_head*head_dim.
    assert hidden == H, "residual requires hidden_dim == n_head * head_dim"

    vmem_cap = _vmem_capacity_bytes()
    block_q = _pick_block_q(qs, ks, hidden, n_head, head_dim,
                            budget_bytes=int(vmem_cap * 0.6))
    vmem_limit = int(vmem_cap * 0.9)
    return _multihead_att_jit(q, kv, mask, wq_t, wkv_t, wo_t, gamma, beta,
                              n_head=n_head, block_q=block_q, vmem_limit=vmem_limit)


def _reference(q, kv, mask, wq_t, wkv_t, wo_t, gamma, beta, n_head):
    """Pure-JAX mirror of the PyTorch forward (eval mode, mem=None, pre_lnorm=False)."""
    bs, qs, hidden = q.shape
    ks = kv.shape[1]
    H = wq_t.shape[1]
    head_dim = H // n_head
    scale = 1.0 / head_dim ** 0.5

    kvp = kv @ wkv_t                                   # (B, Ks, 2H)
    key, value = kvp[..., :H], kvp[..., H:]
    query = q @ wq_t                                   # (B, Qs, H)

    qh = query.reshape(bs, qs, n_head, head_dim)
    kh = key.reshape(bs, ks, n_head, head_dim)
    vh = value.reshape(bs, ks, n_head, head_dim)
    score = jnp.einsum('bqnd,bknd->bqkn', qh, kh) * scale
    score = jnp.where((mask != 0.0)[..., None], -60000.0, score)
    prob = jax.nn.softmax(score, axis=2)
    attended = jnp.einsum('bqkn,bknd->bqnd', prob, vh).reshape(bs, qs, H)

    out = attended @ wo_t + query
    mean = jnp.mean(out, axis=-1, keepdims=True)
    var = jnp.mean((out - mean) ** 2, axis=-1, keepdims=True)
    out = (out - mean) * jax.lax.rsqrt(var + 1e-5) * gamma[0] + beta[0]
    return out, kvp, score


if __name__ == "__main__":
    # Small, module-consistent shapes: hidden_dim = n_head * head_dim (required by residual).
    bs, qs, ks = 2, 8, 8
    n_head, head_dim = 4, 8
    hidden = n_head * head_dim          # 32
    H = n_head * head_dim

    key = jax.random.PRNGKey(0)
    k1, k2, k3, k4, k5, k6 = jax.random.split(key, 6)

    def bf16_repr(x):
        # Quantize to bf16-representable values so kernel (bf16 MXU inputs) and the
        # f32 reference consume numerically identical data.
        return x.astype(jnp.bfloat16).astype(jnp.float32)

    q = bf16_repr(jax.random.normal(k1, (bs, qs, hidden), dtype=jnp.float32))
    kv = bf16_repr(jax.random.normal(k2, (bs, ks, hidden), dtype=jnp.float32))
    # mask: nonzero => masked position (matches mask.bool() semantics)
    mask = (jax.random.uniform(k3, (bs, qs, ks)) < 0.25).astype(jnp.float32)

    # Deterministic synthetic weights, stored as (in, out).
    wq_t = bf16_repr(jax.random.normal(k4, (hidden, H), dtype=jnp.float32) * (1.0 / hidden ** 0.5))
    wkv_t = bf16_repr(jax.random.normal(k5, (hidden, 2 * H), dtype=jnp.float32) * (1.0 / hidden ** 0.5))
    wo_t = bf16_repr(jax.random.normal(k6, (H, hidden), dtype=jnp.float32) * (1.0 / H ** 0.5))
    gamma = jnp.ones((1, hidden), dtype=jnp.float32)
    beta = jnp.zeros((1, hidden), dtype=jnp.float32)

    out, kv_proj, att_score = multihead_att(
        q, kv, mask, wq_t, wkv_t, wo_t, gamma, beta, n_head=n_head)
    jax.block_until_ready((out, kv_proj, att_score))

    ref_out, ref_kvp, ref_score = _reference(
        q, kv, mask, wq_t, wkv_t, wo_t, gamma, beta, n_head)
    np.testing.assert_allclose(np.asarray(out), np.asarray(ref_out), rtol=3e-2, atol=3e-2)
    np.testing.assert_allclose(np.asarray(kv_proj), np.asarray(ref_kvp), rtol=3e-2, atol=3e-2)
    np.testing.assert_allclose(np.asarray(att_score), np.asarray(ref_score), rtol=3e-2, atol=3e-2)

    print("KERNEL_OK")
</pallas_src>

<mosaic_0001>
module attributes {stable_mosaic.version = 11 : i64} {
  func.func @_mha_kernel(%arg0: i32, %arg1: i32, %arg2: memref<1x8x32xbf16, #tpu.memory_space<vmem>>, %arg3: memref<1x4x8x8xbf16, #tpu.memory_space<vmem>>, %arg4: memref<1x4x8x8xbf16, #tpu.memory_space<vmem>>, %arg5: memref<1x8x8xi8, #tpu.memory_space<vmem>>, %arg6: memref<32x32xbf16, #tpu.memory_space<vmem>>, %arg7: memref<32x32xbf16, #tpu.memory_space<vmem>>, %arg8: memref<1x32xf32, #tpu.memory_space<vmem>>, %arg9: memref<1x32xf32, #tpu.memory_space<vmem>>, %arg10: memref<1x8x32xf32, #tpu.memory_space<vmem>>, %arg11: memref<1x4x8x8xbf16, #tpu.memory_space<vmem>>) attributes {dimension_semantics = [#tpu.dimension_semantics<parallel>, #tpu.dimension_semantics<parallel>], iteration_bounds = array<i64: 2, 1>, scalar_prefetch = 0 : i64, scratch_operands = 0 : i64, tpu.core_type = #tpu.core_type<tc>, window_params = [{transform_indices = @transform_0, window_bounds = array<i64: 1, 8, 32>}, {transform_indices = @transform_1, window_bounds = array<i64: 1, 4, 8, 8>}, {transform_indices = @transform_2, window_bounds = array<i64: 1, 4, 8, 8>}, {transform_indices = @transform_3, window_bounds = array<i64: 1, 8, 8>}, {pipeline_mode = #tpu.pipeline_mode<synchronous>, transform_indices = @transform_4, window_bounds = array<i64: 32, 32>}, {pipeline_mode = #tpu.pipeline_mode<synchronous>, transform_indices = @transform_5, window_bounds = array<i64: 32, 32>}, {pipeline_mode = #tpu.pipeline_mode<synchronous>, transform_indices = @transform_6, window_bounds = array<i64: 1, 32>}, {pipeline_mode = #tpu.pipeline_mode<synchronous>, transform_indices = @transform_7, window_bounds = array<i64: 1, 32>}, {transform_indices = @transform_8, window_bounds = array<i64: 1, 8, 32>}, {transform_indices = @transform_9, window_bounds = array<i64: 1, 4, 8, 8>}]} {
    %c0 = arith.constant 0 : index
    %c0_0 = arith.constant 0 : index
    %c0_1 = arith.constant 0 : index
    %0 = vector.load %arg2[%c0, %c0_0, %c0_1] : memref<1x8x32xbf16, #tpu.memory_space<vmem>>, vector<1x8x32xbf16>
    %1 = vector.shape_cast %0 : vector<1x8x32xbf16> to vector<8x32xbf16>
    %c0_2 = arith.constant 0 : index
    %c0_3 = arith.constant 0 : index
    %2 = vector.load %arg6[%c0_2, %c0_3] : memref<32x32xbf16, #tpu.memory_space<vmem>>, vector<32x32xbf16>
    %cst = arith.constant dense<0.000000e+00> : vector<8x32xf32>
    %3 = tpu.matmul %1, %2, %cst {dimension_numbers = #tpu.dot_dimension_numbers<[1], [0], [0], [1], [0, 0, 1, 1], [], []>} : vector<8x32xbf16>, vector<32x32xbf16>, vector<8x32xf32> -> vector<8x32xf32>
    %4 = vector.shape_cast %3 : vector<8x32xf32> to vector<8x4x8xf32>
    %5 = tpu.transpose %4, [1, 0, 2] : vector<8x4x8xf32> -> vector<4x8x8xf32>
    %6 = arith.truncf %5 : vector<4x8x8xf32> to vector<4x8x8xbf16>
    %c0_4 = arith.constant 0 : index
    %c0_5 = arith.constant 0 : index
    %c0_6 = arith.constant 0 : index
    %c0_7 = arith.constant 0 : index
    %7 = vector.load %arg3[%c0_4, %c0_5, %c0_6, %c0_7] : memref<1x4x8x8xbf16, #tpu.memory_space<vmem>>, vector<1x4x8x8xbf16>
    %8 = vector.shape_cast %7 : vector<1x4x8x8xbf16> to vector<4x8x8xbf16>
    "tpu.trace_start"() <{level = 10 : i32, message = "hqd,hdk->hqk"}> : () -> ()
    %cst_8 = arith.constant dense<0.000000e+00> : vector<4x8x8xf32>
    %9 = tpu.matmul %6, %8, %cst_8 {dimension_numbers = #tpu.dot_dimension_numbers<[2], [1], [1], [2], [0, 0, 0, 1, 1, 2], [0], [0]>} : vector<4x8x8xbf16>, vector<4x8x8xbf16>, vector<4x8x8xf32> -> vector<4x8x8xf32>
    "tpu.trace_stop"() : () -> ()
    %c0_9 = arith.constant 0 : index
    %c0_10 = arith.constant 0 : index
    %c0_11 = arith.constant 0 : index
    %10 = vector.load %arg5[%c0_9, %c0_10, %c0_11] : memref<1x8x8xi8, #tpu.memory_space<vmem>>, vector<1x8x8xi8>
    %11 = vector.shape_cast %10 : vector<1x8x8xi8> to vector<8x8xi8>
    %c0_i8 = arith.constant 0 : i8
    %12 = vector.broadcast %c0_i8 : i8 to vector<8x8xi8>
    %13 = arith.cmpi ne, %11, %12 : vector<8x8xi8>
    %14 = vector.shape_cast %13 : vector<8x8xi1> to vector<1x8x8xi1>
    %cst_12 = arith.constant -6.000000e+04 : f32
    %15 = vector.shape_cast %14 : vector<1x8x8xi1> to vector<1x8x8xi1>
    %16 = vector.broadcast %15 : vector<1x8x8xi1> to vector<4x8x8xi1>
    %17 = vector.broadcast %cst_12 : f32 to vector<4x8x8xf32>
    %18 = arith.select %16, %17, %9 : vector<4x8x8xi1>, vector<4x8x8xf32>
    %19 = arith.truncf %18 : vector<4x8x8xf32> to vector<4x8x8xbf16>
    %c0_13 = arith.constant 0 : index
    %c0_14 = arith.constant 0 : index
    %c0_15 = arith.constant 0 : index
    %c0_16 = arith.constant 0 : index
    %20 = vector.load %arg11[%c0_13, %c0_14, %c0_15, %c0_16] : memref<1x4x8x8xbf16, #tpu.memory_space<vmem>>, vector<1x4x8x8xbf16>
    %21 = vector.shape_cast %20 : vector<1x4x8x8xbf16> to vector<4x8x8xbf16>
    %22 = vector.shape_cast %19 : vector<4x8x8xbf16> to vector<1x4x8x8xbf16>
    tpu.vector_store %arg11[%c0_13, %c0_14, %c0_15, %c0_16], %22 {strides = array<i32>} : memref<1x4x8x8xbf16, #tpu.memory_space<vmem>>, vector<1x4x8x8xbf16>,
    %cst_17 = arith.constant dense<0xFF800000> : vector<4x8xf32>
    %23 = vector.multi_reduction <maximumf>, %18, %cst_17 [2] : vector<4x8x8xf32> to vector<4x8xf32>
    %24 = vector.shape_cast %23 : vector<4x8xf32> to vector<4x8x1xf32>
    %25 = vector.broadcast %24 : vector<4x8x1xf32> to vector<4x8x8xf32>
    %26 = arith.subf %18, %25 : vector<4x8x8xf32>
    %27 = math.exp %26 : vector<4x8x8xf32>
    %cst_18 = arith.constant dense<0.000000e+00> : vector<4x8xf32>
    %28 = vector.multi_reduction <add>, %27, %cst_18 [2] : vector<4x8x8xf32> to vector<4x8xf32>
    %29 = vector.shape_cast %28 : vector<4x8xf32> to vector<4x8x1xf32>
    %30 = arith.truncf %27 : vector<4x8x8xf32> to vector<4x8x8xbf16>
    %c0_19 = arith.constant 0 : index
    %c0_20 = arith.constant 0 : index
    %c0_21 = arith.constant 0 : index
    %c0_22 = arith.constant 0 : index
    %31 = vector.load %arg4[%c0_19, %c0_20, %c0_21, %c0_22] : memref<1x4x8x8xbf16, #tpu.memory_space<vmem>>, vector<1x4x8x8xbf16>
    %32 = vector.shape_cast %31 : vector<1x4x8x8xbf16> to vector<4x8x8xbf16>
    "tpu.trace_start"() <{level = 10 : i32, message = "hqk,hkd->hqd"}> : () -> ()
    %cst_23 = arith.constant dense<0.000000e+00> : vector<4x8x8xf32>
    %33 = tpu.matmul %30, %32, %cst_23 {dimension_numbers = #tpu.dot_dimension_numbers<[2], [1], [1], [2], [0, 0, 0, 1, 1, 2], [0], [0]>} : vector<4x8x8xbf16>, vector<4x8x8xbf16>, vector<4x8x8xf32> -> vector<4x8x8xf32>
    "tpu.trace_stop"() : () -> ()
    %34 = tpu.reciprocal %29 {approx = true} : vector<4x8x1xf32> -> vector<4x8x1xf32>
    %35 = vector.broadcast %34 : vector<4x8x1xf32> to vector<4x8x8xf32>
    %36 = arith.mulf %33, %35 : vector<4x8x8xf32>
    %37 = tpu.transpose %36, [1, 0, 2] : vector<4x8x8xf32> -> vector<8x4x8xf32>
    %38 = vector.shape_cast %37 : vector<8x4x8xf32> to vector<8x32xf32>
    %39 = arith.truncf %38 : vector<8x32xf32> to vector<8x32xbf16>
    %c0_24 = arith.constant 0 : index
    %c0_25 = arith.constant 0 : index
    %40 = vector.load %arg7[%c0_24, %c0_25] : memref<32x32xbf16, #tpu.memory_space<vmem>>, vector<32x32xbf16>
    %cst_26 = arith.constant dense<0.000000e+00> : vector<8x32xf32>
    %41 = tpu.matmul %39, %40, %cst_26 {dimension_numbers = #tpu.dot_dimension_numbers<[1], [0], [0], [1], [0, 0, 1, 1], [], []>} : vector<8x32xbf16>, vector<32x32xbf16>, vector<8x32xf32> -> vector<8x32xf32>
    %42 = arith.addf %41, %3 : vector<8x32xf32>
    %cst_27 = arith.constant dense<0.000000e+00> : vector<8xf32>
    %43 = vector.multi_reduction <add>, %42, %cst_27 [1] : vector<8x32xf32> to vector<8xf32>
    %44 = vector.shape_cast %43 : vector<8xf32> to vector<8x1xf32>
    %cst_28 = arith.constant 3.200000e+01 : f32
    %45 = vector.broadcast %cst_28 : f32 to vector<8x1xf32>
    %46 = arith.divf %44, %45 : vector<8x1xf32>
    %47 = vector.broadcast %46 : vector<8x1xf32> to vector<8x32xf32>
    %48 = arith.subf %42, %47 : vector<8x32xf32>
    %49 = arith.mulf %48, %48 : vector<8x32xf32>
    %cst_29 = arith.constant dense<0.000000e+00> : vector<8xf32>
    %50 = vector.multi_reduction <add>, %49, %cst_29 [1] : vector<8x32xf32> to vector<8xf32>
    %51 = vector.shape_cast %50 : vector<8xf32> to vector<8x1xf32>
    %cst_30 = arith.constant 3.200000e+01 : f32
    %52 = vector.broadcast %cst_30 : f32 to vector<8x1xf32>
    %53 = arith.divf %51, %52 : vector<8x1xf32>
    %54 = vector.broadcast %46 : vector<8x1xf32> to vector<8x32xf32>
    %55 = arith.subf %42, %54 : vector<8x32xf32>
    %cst_31 = arith.constant 9.99999974E-6 : f32
    %56 = vector.broadcast %cst_31 : f32 to vector<8x1xf32>
    %57 = arith.addf %53, %56 : vector<8x1xf32>
    %58 = math.rsqrt %57 : vector<8x1xf32>
    %59 = vector.broadcast %58 : vector<8x1xf32> to vector<8x32xf32>
    %60 = arith.mulf %55, %59 : vector<8x32xf32>
    %c0_32 = arith.constant 0 : index
    %c0_33 = arith.constant 0 : index
    %61 = vector.load %arg8[%c0_32, %c0_33] : memref<1x32xf32, #tpu.memory_space<vmem>>, vector<1x32xf32>
    %62 = vector.broadcast %61 : vector<1x32xf32> to vector<8x32xf32>
    %63 = arith.mulf %60, %62 : vector<8x32xf32>
    %c0_34 = arith.constant 0 : index
    %c0_35 = arith.constant 0 : index
    %64 = vector.load %arg9[%c0_34, %c0_35] : memref<1x32xf32, #tpu.memory_space<vmem>>, vector<1x32xf32>
    %65 = vector.broadcast %64 : vector<1x32xf32> to vector<8x32xf32>
    %66 = arith.addf %63, %65 : vector<8x32xf32>
    %c0_36 = arith.constant 0 : index
    %c0_37 = arith.constant 0 : index
    %c0_38 = arith.constant 0 : index
    %67 = vector.load %arg10[%c0_36, %c0_37, %c0_38] : memref<1x8x32xf32, #tpu.memory_space<vmem>>, vector<1x8x32xf32>
    %68 = vector.shape_cast %67 : vector<1x8x32xf32> to vector<8x32xf32>
    %69 = vector.shape_cast %66 : vector<8x32xf32> to vector<1x8x32xf32>
    tpu.vector_store %arg10[%c0_36, %c0_37, %c0_38], %69 {strides = array<i32>} : memref<1x8x32xf32, #tpu.memory_space<vmem>>, vector<1x8x32xf32>,
    return
  }
  func.func @transform_0(%arg0: i32, %arg1: i32) -> (i32, i32, i32) {
    %c0_i32 = arith.constant 0 : i32
    %c0_i32_0 = arith.constant 0 : i32
    return %arg0, %arg1, %c0_i32 : i32, i32, i32
  }
  func.func @transform_1(%arg0: i32, %arg1: i32) -> (i32, i32, i32, i32) {
    %c0_i32 = arith.constant 0 : i32
    %c0_i32_0 = arith.constant 0 : i32
    %c0_i32_1 = arith.constant 0 : i32
    %c0_i32_2 = arith.constant 0 : i32
    return %arg0, %c0_i32, %c0_i32_0, %c0_i32_1 : i32, i32, i32, i32
  }
  func.func @transform_2(%arg0: i32, %arg1: i32) -> (i32, i32, i32, i32) {
    %c0_i32 = arith.constant 0 : i32
    %c0_i32_0 = arith.constant 0 : i32
    %c0_i32_1 = arith.constant 0 : i32
    %c0_i32_2 = arith.constant 0 : i32
    return %arg0, %c0_i32, %c0_i32_0, %c0_i32_1 : i32, i32, i32, i32
  }
  func.func @transform_3(%arg0: i32, %arg1: i32) -> (i32, i32, i32) {
    %c0_i32 = arith.constant 0 : i32
    %c0_i32_0 = arith.constant 0 : i32
    return %arg0, %arg1, %c0_i32 : i32, i32, i32
  }
  func.func @transform_4(%arg0: i32, %arg1: i32) -> (i32, i32) {
    %c0_i32 = arith.constant 0 : i32
    %c0_i32_0 = arith.constant 0 : i32
    %c0_i32_1 = arith.constant 0 : i32
    return %c0_i32, %c0_i32_0 : i32, i32
  }
  func.func @transform_5(%arg0: i32, %arg1: i32) -> (i32, i32) {
    %c0_i32 = arith.constant 0 : i32
    %c0_i32_0 = arith.constant 0 : i32
    %c0_i32_1 = arith.constant 0 : i32
    return %c0_i32, %c0_i32_0 : i32, i32
  }
  func.func @transform_6(%arg0: i32, %arg1: i32) -> (i32, i32) {
    %c0_i32 = arith.constant 0 : i32
    %c0_i32_0 = arith.constant 0 : i32
    %c0_i32_1 = arith.constant 0 : i32
    return %c0_i32, %c0_i32_0 : i32, i32
  }
  func.func @transform_7(%arg0: i32, %arg1: i32) -> (i32, i32) {
    %c0_i32 = arith.constant 0 : i32
    %c0_i32_0 = arith.constant 0 : i32
    %c0_i32_1 = arith.constant 0 : i32
    return %c0_i32, %c0_i32_0 : i32, i32
  }
  func.func @transform_8(%arg0: i32, %arg1: i32) -> (i32, i32, i32) {
    %c0_i32 = arith.constant 0 : i32
    %c0_i32_0 = arith.constant 0 : i32
    return %arg0, %arg1, %c0_i32 : i32, i32, i32
  }
  func.func @transform_9(%arg0: i32, %arg1: i32) -> (i32, i32, i32, i32) {
    %c0_i32 = arith.constant 0 : i32
    %c0_i32_0 = arith.constant 0 : i32
    %c0_i32_1 = arith.constant 0 : i32
    return %arg0, %c0_i32, %arg1, %c0_i32_0 : i32, i32, i32, i32
  }
}

</mosaic_0001>

<bundles_post_ra>
// kernel: _multihead_att_jit.1
= control target key start
LH: loop header
LB: loop body
LE: loop exit
PB: predicated region body
PF: predicated region fallthrough
CT: control target
= control target key end

     0   :  { %s1761_s0 = inlined_call_operand.vmem [shape: bf16[2,8,32], index: 0, kind: input, shape index: {}]   ;;  %s1762_s1 = inlined_call_operand.vmem [shape: bf16[2,4,8,8], index: 1, kind: input, shape index: {}]   ;;  %s1763_s2 = inlined_call_operand.vmem [shape: bf16[2,4,8,8], index: 2, kind: input, shape index: {}]   ;;  %s1764_s3 = inlined_call_operand.vmem [shape: s8[2,8,8], index: 3, kind: input, shape index: {}]   ;;  %s1765_s4 = inlined_call_operand.vmem [shape: bf16[32,32], index: 4, kind: input, shape index: {}]   ;;  %s1766_s5 = inlined_call_operand.vmem [shape: bf16[32,32], index: 5, kind: input, shape index: {}]   ;;  %s1767_s6 = inlined_call_operand.vmem [shape: f32[1,32], index: 6, kind: input, shape index: {}]   ;;  %s1768_s7 = inlined_call_operand.vmem [shape: f32[1,32], index: 7, kind: input, shape index: {}]   ;;  %s1769_s8 = inlined_call_operand.hbm [shape: f32[2,8,32], index: 8, kind: output, shape index: {0}]   ;;  %s1770_s9 = inlined_call_operand.vmem [shape: bf16[2,4,8,8], index: 9, kind: output, shape index: {1}]  }
   0x1   :  { %1771 = sst [smem:[#allocation5_spill]] %s1761_s0 }
   0x2   :  { %15 = vsyncpa [#allocation3], 0 }
   0x3   :  { %17 = vsyncpa [#allocation3 + $0x1], 0  ;;  %s1486_s30 = smov 0   ;;  %s1488_s10 = smov 0  }
   0x4   :  { %s1490_s11 = smov 0   ;;  %s1492_s12 = smov 0  }
   0x5   :  { %s1494_s13 = smov 0   ;;  %s1496_s14 = smov 0  }
   0x6 LB: > { %s1208_s15 = sadd.s32 4294967295, %s1424_s14   ;;  %s1209_s16 = sadd.s32 4294967294, %s1424_s14   ;;  %s1424_s14 = sphi %s1496_s14, %s23_s14   ;;  %s1420_s13 = sphi %s1494_s13, %s1781_s13   ;;  %s1416_s12 = sphi %s1492_s12, %s1780_s12   ;;  %s1412_s11 = sphi %s1490_s11, %s1779_s11   ;;  %s1408_s10 = sphi %s1488_s10, %s1778_s10   ;;  %s1404_s30 = sphi %s1486_s30, %s1777_s30  }
   0x7   : > { %s35_s17 = sadd.s32 1, %s1420_s13  ;;  %s236_s18 = sadd.s32 1, %s1412_s11 }
   0x8   : > { %p37_p0 = scmp.ge.s32.totalorder %s35_s17, 2  ;;  %p246_p1 = scmp.ne.s32.totalorder %s1412_s11, %s1408_s10 }
   0x9   : > { %p247_p2 = scmp.eq.s32.totalorder %s1208_s15, 1  ;;  %p252_p3 = scmp.ne.s32.totalorder %s1408_s10, %s1404_s30 }
   0xa   : > { %s1783_s17 = smov (%p37_p0, %s35_s17), 0  ;;  %p253_p5 = scmp.eq.s32.totalorder %s1209_s16, 1 }
   0xb   : > { %p1526_p4 = por %p247_p2, %p246_p1  ;;  %s231_s20 = ssub.s32 %s1420_s13, %s1783_s17 }
   0xc   : > { %p1212_p6 = scmp.ge.s32.totalorder %s1424_s14, 1  ;;  %p234_p7 = scmp.eq.s32.totalorder %s231_s20, 0 }
   0xd   : > { %p1533_p8 = por %p253_p5, %p252_p3  ;;  %p347_p9 = scmp.lt.s32.totalorder %s1424_s14, 3 }
   0xe   : > { %s1539_s22 = scalar_select %p234_p7, %s1412_s11, %s236_s18  }
   0xf   : > { %p348_p10 = pnand %p1212_p6, %p347_p9 }
  0x10   : > { %p410_p11 = scmp.lt.s32.totalorder (!%p348_p10), %s1416_s12, 1  ;;  %s1774_s0 = sld [smem:[#allocation5_spill]] (!%p348_p10) }
  0x11   : > { %351 = sbr.rel (%p348_p10) target bundleno = 1264 (0x4f0), region = 52  ;;  %s1426_s18 = smov (!%p348_p10), 104  }
  0x12   : > { %s1427_s20 = smov (!%p348_p10), 120   ;;  %s1428_s23 = smov (!%p348_p10), 112  }
  0x13   : > { %s1434_s15 = smov (!%p348_p10), 8   ;;  %s1249_s26 = sshll.u32 (!%p348_p10), %s1416_s12, 3 }
  0x16   : > { %v1256_v0 = vld [vmem:[%s1765_s4 + $0x8] sm:$0xff]  ;;  %v1255_v1 = vld [vmem:[%s1765_s4] sm:$0xff]  ;;  %s1549_s27 = scalar_select %p410_p11, %s1416_s12, 1  ;;  %vm462_vm0 = vcmask 261120   ;;  %vm612_vm1 = vcmask 1043456   ;;  %vm490_vm2 = vcmask 1047556  }
  0x17   : > { %472 = vmatpush.bf16.msra.mxu0 %v1256_v0  ;;  %v1429_v9 = vmov 1983009808   ;;  %v1430_v20 = vmov 1934713408   ;;  %vm608_vm3 = vcmask 64512   ;;  %vm701_vm6 = vcmask 60416  }
  0x18   : > { %s1214_s28 = sshll.u32 %s1549_s27, 2  ;;  %s1562_s24 = sshll.u32 %s1549_s27, 4  ;;  %v495_v10 = vunpack.c.l.s4 %v1429_v9  ;;  %v519_v21 = vunpack.c.l.s4 %v1430_v20  ;;  %vm957_vm7 = vcmask 130048   ;;  %vm959_vm8 = vcmask 195584  }
  0x19   : > { %s416_s16 = scalar_lea.vmem %s1774_s0, %s1214_s28  ;;  %s421_s28 = scalar_lea.vmem %s1762_s1, %s1562_s24 }
  0x1a   : > { %v445_v2 = vld [vmem:[%s416_s16] sm:$0xf]  ;;  %v606_v5 = vld [vmem:[%s421_s28 + $0x8] sm:$0xf]  ;;  %v605_v13 = vld [vmem:[%s421_s28 + $0x4] sm:$0xf]  ;;  %v1571_v17 = vunpack.c.0.s8 %v495_v10  ;;  %v1579_v28 = vunpack.c.0.s8 %v519_v21  ;;  %s441_s25 = scalar_lea.vmem %s1770_s9, %s1562_s24  ;;  %s1054_s16 = scalar_lea.hbm %s1769_s8, %s1249_s26 }
  0x1b   : > { %473 = vmatpush.bf16.msra.mxu0 %v1255_v1  ;;  %v604_v6 = vld [vmem:[%s421_s28] sm:$0xf]  ;;  %v652_v7 = vsel %vm612_vm1, %v606_v5, 0  ;;  %v633_v16 = vsel %vm612_vm1, %v605_v13, 0  ;;  %v607_v22 = vld [vmem:[%s421_s28 + $0xc] sm:$0xf]  ;;  %s426_s28 = scalar_lea.vmem %s1763_s2, %s1562_s24 }
  0x1c   : > { %v614_v8 = vsel %vm612_vm1, %v604_v6, 0  ;;  %661 = vmatpush.bf16.msra.mxu3 %v652_v7  ;;  %642 = vmatpush.bf16.msra.mxu2 %v633_v16  ;;  %v671_v24 = vsel %vm612_vm1, %v607_v22, 0  ;;  %s1219_s29 = sshll.u32 %s1549_s27, 1  ;;  %s1432_s24 = smov 24  }
  0x1d   : > { %623 = vmatpush.bf16.msra.mxu1 %v614_v8  ;;  %s1058_s0 = sshll.u32 %s1054_s16, 4  ;;  %s1059_s0 = int_to_ptr.hbm [resolvable:$true] %s1058_s0 }
  0x1e   : > { %1230 = vmatmul.msk.bf16.vlgmr.msra.gmra.mxu0 %vm462_vm0, %v445_v2 }
  0x21   : > { %680 = vmatpush.bf16.msrb.mxu1 %v671_v24 }
  0x9b   : > { %v1556_v3 = vpop.f32.mrf.mxu0 }
  0x9c   : > { %486 = vrot.lane.b32.xlu1 %v1556_v3, %s1426_s18  ;;  %480 = vrot.lane.b32.xlu0 %v1556_v3, %s1427_s20  ;;  %v492_v25 = vrot.slane %v1556_v3, 4  ;;  %s433_s18 = scalar_lea.vmem %s1764_s3, %s1219_s29  ;;  %s1433_s29 = smov 16  }
  0xa3   : > { %v477_v4 = vpop.f32.mrf.mxu0 }
  0xa4   : > { %483 = vrot.lane.b32.xlu0 %v1556_v3, %s1428_s23 }
 0x10e   : > { %v487_v11 = vpop.permute.xlu1 %486  ;;  %v481_v12 = vpop.permute.xlu0 %480 }
 0x10f   : > { %v502_v14 = vrot.slane %v487_v11, 4  ;;  %v504_v15 = vrot.slane %v481_v12, 4 }
 0x111   : > { %v505_v18 = vsel %vm490_vm2, %v487_v11, %v504_v15  ;;  %v503_v19 = vsel %vm490_vm2, %v502_v14, %v481_v12 }
 0x112   : > { %v513_v23 = vperm.slane %v505_v18, %v1571_v17  ;;  %v509_v26 = vperm.slane %v503_v19, %v1571_v17 }
 0x114   : > { %v526_v31 = vrot.slane %v513_v23, 4  ;;  %v514_v34 = vrot.slane %v509_v26, 4 }
 0x116   : > { %v484_v27 = vpop.permute.xlu0 %483 }
 0x117   : > { %v489_v29 = vrot.slane %v484_v27, 4  ;;  %v493_v30 = vsel %vm490_vm2, %v484_v27, %v492_v25  ;;  %v1431_v27 = vmov 0  }
 0x118   : > { %v501_v32 = vperm.slane %v493_v30, %v1571_v17 }
 0x119   : > { %v491_v33 = vsel %vm490_vm2, %v489_v29, %v1556_v3 }
 0x11a   : > { %v497_v35 = vperm.slane %v491_v33, %v1571_v17  ;;  %v527_v36 = vsel %vm490_vm2, %v526_v31, %v501_v32  ;;  %v528_v37 = vrot.slane %v501_v32, 4 }
 0x11b   : > { %v533_v38 = vperm.slane %v527_v36, %v1579_v28 }
 0x11c   : > { %v515_v39 = vsel %vm490_vm2, %v514_v34, %v497_v35  ;;  %v516_v40 = vrot.slane %v497_v35, 4  ;;  %v529_v41 = vsel %vm490_vm2, %v513_v23, %v528_v37 }
 0x11d   : > { %v521_v42 = vperm.slane %v515_v39, %v1579_v28  ;;  %v537_v43 = vperm.slane %v529_v41, %v1579_v28  ;;  %v542_v46 = vrot.slane %v533_v38, 4 }
 0x11e   : > { %v517_v44 = vsel %vm490_vm2, %v509_v26, %v516_v40  ;;  %v686_v26 = vld [vmem:[%s433_s18] sm:$0x3] }
 0x11f   : > { %v525_v45 = vperm.slane %v517_v44, %v1579_v28  ;;  %v544_v47 = vrot.slane %v537_v43, 4  ;;  %v538_v48 = vrot.slane %v521_v42, 4  ;;  %v543_v55 = vsel %vm490_vm2, 0.0, %v542_v46 }
 0x120   : > { %vm687_vm4 = vnez %v686_v26 }
 0x121   : > { %v540_v49 = vrot.slane %v525_v45, 4  ;;  %v545_v50 = vsel %vm490_vm2, 0.0, %v544_v47  ;;  %v557_v51 = vsel %vm490_vm2, %v544_v47, %v533_v38  ;;  %v539_v61 = vsel %vm490_vm2, 0.0, %v538_v48 }
 0x122   : > { %v561_v52 = vperm.slane %v557_v51, %v1571_v17  ;;  %v562_v53 = vrot.slane %v545_v50, 4  ;;  %v688_v29 = vsel %vm687_vm4, 16843009, %v1431_v27 }
 0x123   : > { %v541_v54 = vsel %vm490_vm2, 0.0, %v540_v49  ;;  %v546_v56 = vsel %vm490_vm2, %v540_v49, %v521_v42  ;;  %v689_v30 = vunpack.c.0.s8 %v688_v29 }
 0x124   : > { %v551_v57 = vrot.slane %v541_v54, 4  ;;  %v563_v58 = vsel %vm490_vm2, %v562_v53, %v543_v55  ;;  %v582_v59 = vrot.slane %v561_v52, 4  ;;  %v550_v60 = vperm.slane %v546_v56, %v1571_v17  ;;  %v747_v54 = vld [vmem:[%s426_s28 + $0x4] sm:$0xf]  ;;  %v748_v56 = vld [vmem:[%s426_s28 + $0x8] sm:$0xf] }
 0x125   : > { %v567_v62 = vperm.slane %v563_v58, %v1571_v17  ;;  %vm1626_vm5 = vcmp.ne.s32.totalorder %v689_v30, 0  ;;  %v773_v55 = vsel %vm612_vm1, %v747_v54, 0  ;;  %v792_v58 = vsel %vm612_vm1, %v748_v56, 0 }
 0x126   : > { %v552_v63 = vsel %vm490_vm2, %v551_v57, %v539_v61  ;;  %v570_v0 = vrot.slane %v550_v60, 4  ;;  %782 = vmatpush.bf16.msrb.mxu3 %v773_v55  ;;  %v749_v57 = vld [vmem:[%s426_s28 + $0xc] sm:$0xf]  ;;  %801 = vmatpush.bf16.msrb.mxu0 %v792_v58 }
 0x127   : > { %v556_v1 = vperm.slane %v552_v63, %v1571_v17  ;;  %v583_v2 = vsel %vm490_vm2, %v567_v62, %v582_v59  ;;  %v580_v4 = vrot.slane %v567_v62, 4  ;;  %v811_v59 = vsel %vm612_vm1, %v749_v57, 0 }
 0x128   : > { %v591_v5 = vperm.slane %v583_v2, %v1579_v28 }
 0x129   : > { %v571_v6 = vsel %vm490_vm2, %v556_v1, %v570_v0  ;;  %v568_v7 = vrot.slane %v556_v1, 4  ;;  %v581_v8 = vsel %vm490_vm2, %v580_v4, %v561_v52  ;;  %v746_v52 = vld [vmem:[%s426_s28] sm:$0xf] }
 0x12a   : > { %v579_v9 = vperm.slane %v571_v6, %v1579_v28  ;;  %v596_v10 = vrot.slane %v591_v5, 4  ;;  %v587_v11 = vperm.slane %v581_v8, %v1579_v28  ;;  %v754_v53 = vsel %vm612_vm1, %v746_v52, 0 }
 0x12b   : > { %v569_v12 = vsel %vm490_vm2, %v568_v7, %v550_v60  ;;  %763 = vmatpush.bf16.msrb.mxu2 %v754_v53 }
 0x12c   : > { %v597_v13 = vsel %vm490_vm2, %v596_v10, %v579_v9  ;;  %v575_v14 = vperm.slane %v569_v12, %v1579_v28  ;;  %v592_v15 = vrot.slane %v587_v11, 4  ;;  %v598_v23 = vrot.slane %v579_v9, 4 }
 0x12d   : > { %v602_v16 = vpack.c.bf16 %v597_v13, %v597_v13 }
 0x12e   : > { %v593_v18 = vsel %vm490_vm2, %v592_v15, %v575_v14  ;;  %v594_v19 = vrot.slane %v575_v14, 4  ;;  %v599_v24 = vsel %vm490_vm2, %v591_v5, %v598_v23 }
 0x12f   : > { %1233 = vmatmul.msk.bf16.vlgmr.msra.gmra.mxu3 %vm608_vm3, %v602_v16  ;;  %v600_v20 = vpack.c.bf16 %v593_v18, %v593_v18  ;;  %v603_v25 = vpack.c.bf16 %v599_v24, %v599_v24 }
 0x130   : > { %v595_v21 = vsel %vm490_vm2, %v587_v11, %v594_v19 }
 0x131   : > { %1231 = vmatmul.msk.bf16.vlgmr.msra.gmra.mxu1 %vm608_vm3, %v600_v20  ;;  %v601_v22 = vpack.c.bf16 %v595_v21, %v595_v21 }
 0x132   : > { %820 = vmatpush.bf16.msra.mxu1 %v811_v59 }
 0x133   : > { %1232 = vmatmul.msk.bf16.vlgmr.msra.gmra.mxu2 %vm608_vm3, %v601_v22 }
 0x141   : > { %1234 = vmatmul.msk.bf16.vlgmr.msrb.gmra.mxu1 %vm608_vm3, %v603_v25 }
 0x1ae   : > { %v625_v32 = vpop.f32.mrf.mxu1 }
 0x1af   : > { %v693_v33 = vsel %vm1626_vm5, -60000.0, %v625_v32 }
 0x1b0   : > { %v697_v34 = vpack.c.bf16 %v693_v33, %v693_v33  ;;  %v706_v35 = vsel %vm608_vm3, %v693_v33, -inf }
 0x1b1   : > { %707 = vmax.xlane.f32.xlu1 %v706_v35 }
 0x1b2   : > { %702 = vst.msk [vmem:[%s441_s25] sm:$0xf] %vm701_vm6, %v697_v34  ;;  %v663_v36 = vpop.f32.mrf.mxu3 }
 0x1b3   : > { %v695_v37 = vsel %vm1626_vm5, -60000.0, %v663_v36 }
 0x1b4   : > { %v699_v38 = vpack.c.bf16 %v695_v37, %v695_v37  ;;  %v712_v49 = vsel %vm608_vm3, %v695_v37, -inf }
 0x1b6   : > { %704 = vst.msk [vmem:[%s441_s25 + $0x8] sm:$0xf] %vm701_vm6, %v699_v38  ;;  %v627_v39 = vpop.f32.mrf.mxu1  ;;  %v644_v40 = vpop.f32.mrf.mxu2 }
 0x1b7   : > { %v694_v41 = vsel %vm1626_vm5, -60000.0, %v644_v40 }
 0x1b8   : > { %v698_v42 = vpack.c.bf16 %v694_v41, %v694_v41  ;;  %v709_v43 = vsel %vm608_vm3, %v694_v41, -inf }
 0x1b9   : > { %710 = vmax.xlane.f32.xlu2 %v709_v43 }
 0x1ba   : > { %703 = vst.msk [vmem:[%s441_s25 + $0x4] sm:$0xf] %vm701_vm6, %v698_v42  ;;  %v665_v44 = vpop.f32.mrf.mxu3 }
 0x1be   : > { %v646_v45 = vpop.f32.mrf.mxu2  ;;  %v682_v46 = vpop.f32.mrf.mxu1 }
 0x1bf   : > { %v696_v47 = vsel %vm1626_vm5, -60000.0, %v682_v46 }
 0x1c0   : > { %v700_v48 = vpack.c.bf16 %v696_v47, %v696_v47  ;;  %v715_v50 = vsel %vm608_vm3, %v696_v47, -inf }
 0x1c1   : > { %713 = vmax.xlane.f32.xlu2 %v712_v49  ;;  %716 = vmax.xlane.f32.xlu0 %v715_v50 }
 0x1c2   : > { %705 = vst.msk [vmem:[%s441_s25 + $0xc] sm:$0xf] %vm701_vm6, %v700_v48  ;;  %s397_s25 = sand.u32 1, %s1408_s10  }
 0x1c3   : > { %s1213_s27 = sshll.u32 %s397_s25, 3  ;;  %s1035_s28 = scalar_lea.sflag [#allocation3], %s397_s25 }
 0x1c4   : > { %s399_s23 = scalar_lea.vmem [#allocation2], %s1213_s27  ;;  %s1366_s27 = scalar_lea.hbm %s1769_s8, 16 }
 0x1c5   : > { %s1056_s12 = sshll.u32 %s399_s23, 4  ;;  %s1057_s12 = int_to_ptr.vmem [resolvable:$true] %s1056_s12 }
 0x1c6   : > { %v684_v51 = vpop.f32.mrf.mxu1 }
 0x224   : > { %v708_v60 = vpop.xlane.xlu1 %707 }
 0x225   : > { %v718_v61 = vsub.f32 %v693_v33, %v708_v60 }
 0x227   : > { %v722_v62 = vmul.f32 1.442695, %v718_v61 }
 0x229   : > { %1326 = vpow2.f32 %v722_v62 }
 0x22c   : > { %v711_v63 = vpop.xlane.xlu2 %710 }
 0x22d   : > { %v719_v0 = vsub.f32 %v694_v41, %v711_v63 }
 0x22f   : > { %v1327_v1 = vpop.eup %1326  ;;  %v724_v2 = vmul.f32 1.442695, %v719_v0 }
 0x230   : > { %v730_v4 = vsel %vm608_vm3, %v1327_v1, 0.0  ;;  %v742_v5 = vpack.c.bf16 %v1327_v1, %v1327_v1 }
 0x231   : > { %1328 = vpow2.f32 %v724_v2  ;;  %731 = vadd.xlane.f32.xlu2 %v730_v4 }
 0x232   : > { %1235 = vmatmul.msk.bf16.vlgmr.msrb.gmra.mxu2 %vm608_vm3, %v742_v5 }
 0x234   : > { %v714_v6 = vpop.xlane.xlu2 %713  ;;  %v717_v7 = vpop.xlane.xlu0 %716 }
 0x235   : > { %v720_v8 = vsub.f32 %v695_v37, %v714_v6  ;;  %v721_v9 = vsub.f32 %v696_v47, %v717_v7 }
 0x237   : > { %v1329_v10 = vpop.eup %1328  ;;  %v726_v11 = vmul.f32 1.442695, %v720_v8  ;;  %v728_v12 = vmul.f32 1.442695, %v721_v9 }
 0x238   : > { %v743_v13 = vpack.c.bf16 %v1329_v10, %v1329_v10  ;;  %v733_v21 = vsel %vm608_vm3, %v1329_v10, 0.0 }
 0x239   : > { %1330 = vpow2.f32 %v726_v11 }
 0x23a   : > { %1332 = vpow2.f32 %v728_v12  ;;  %1236 = vmatmul.msk.bf16.vlgmr.msrb.gmra.mxu3 %vm608_vm3, %v743_v13 }
 0x23f   : > { %v1331_v14 = vpop.eup %1330 }
 0x240   : > { %v1333_v15 = vpop.eup %1332  ;;  %v736_v16 = vsel %vm608_vm3, %v1331_v14, 0.0  ;;  %v744_v18 = vpack.c.bf16 %v1331_v14, %v1331_v14 }
 0x241   : > { %v745_v19 = vpack.c.bf16 %v1333_v15, %v1333_v15  ;;  %737 = vadd.xlane.f32.xlu2 %v736_v16  ;;  %v739_v20 = vsel %vm608_vm3, %v1333_v15, 0.0 }
 0x242   : > { %1237 = vmatmul.msk.bf16.vlgmr.msrb.gmra.mxu0 %vm608_vm3, %v744_v18 }
 0x243   : > { %1238 = vmatmul.msk.bf16.vlgmr.msra.gmra.mxu1 %vm608_vm3, %v745_v19 }
 0x249   : > { %740 = vadd.xlane.f32.xlu2 %v739_v20 }
 0x251   : > { %734 = vadd.xlane.f32.xlu2 %v733_v21 }
 0x2a4   : > { %v732_v22 = vpop.xlane.xlu2 %731 }
 0x2b4   : > { %v738_v23 = vpop.xlane.xlu2 %737 }
 0x2b5   : > { %v765_v24 = vpop.f32.mrf.mxu2  ;;  %1334 = vrcp.f32 %v738_v23 }
 0x2b6   : > { %1336 = vrcp.f32 %v732_v22 }
 0x2bb   : > { %v1335_v29 = vpop.eup %1334 }
 0x2bc   : > { %v741_v25 = vpop.xlane.xlu2 %740  ;;  %v1337_v33 = vpop.eup %1336 }
 0x2bd   : > { %v767_v26 = vpop.f32.mrf.mxu2  ;;  %v784_v27 = vpop.f32.mrf.mxu3  ;;  %1338 = vrcp.f32 %v741_v25  ;;  %v830_v34 = vmul.f32 %v1337_v33, %v765_v24 }
 0x2bf   : > { %v803_v30 = vpop.f32.mrf.mxu0  ;;  %v836_v40 = vrot.slane %v830_v34, 4 }
 0x2c0   : > { %v832_v31 = vmul.f32 %v1335_v29, %v803_v30  ;;  %v822_v32 = vpop.f32.mrf.mxu1 }
 0x2c2   : > { %v834_v35 = vrot.slane %v832_v31, 4  ;;  %v837_v44 = vsel %vm490_vm2, %v832_v31, %v836_v40 }
 0x2c3   : > { %v1339_v37 = vpop.eup %1338  ;;  %v845_v49 = vperm.slane %v837_v44, %v1571_v17 }
 0x2c4   : > { %v735_v36 = vpop.xlane.xlu2 %734  ;;  %v835_v41 = vsel %vm490_vm2, %v834_v35, %v830_v34  ;;  %v833_v42 = vmul.f32 %v1339_v37, %v822_v32 }
 0x2c5   : > { %1340 = vrcp.f32 %v735_v36  ;;  %v786_v38 = vpop.f32.mrf.mxu3  ;;  %v841_v46 = vperm.slane %v835_v41, %v1571_v17  ;;  %v872_v55 = vrot.slane %v845_v49, 4 }
 0x2c6   : > { %v846_v47 = vrot.slane %v833_v42, 4 }
 0x2c7   : > { %v805_v39 = vpop.f32.mrf.mxu0  ;;  %v860_v52 = vrot.slane %v841_v46, 4 }
 0x2c8   : > { %v824_v43 = vpop.f32.mrf.mxu1 }
 0x2c9   : > { %v1258_v43 = vld [vmem:[%s1766_s5 + $0x8] sm:$0xff] }
 0x2ca   : > { %987 = vmatpush.bf16.msra.mxu2 %v1258_v43 }
 0x2cb   : > { %v1341_v45 = vpop.eup %1340 }
 0x2cc   : > { %v831_v48 = vmul.f32 %v1341_v45, %v784_v27 }
 0x2ce   : > { %v847_v50 = vsel %vm490_vm2, %v846_v47, %v831_v48  ;;  %v848_v51 = vrot.slane %v831_v48, 4 }
 0x2cf   : > { %v853_v53 = vperm.slane %v847_v50, %v1571_v17 }
 0x2d0   : > { %v849_v54 = vsel %vm490_vm2, %v833_v42, %v848_v51 }
 0x2d1   : > { %v857_v56 = vperm.slane %v849_v54, %v1571_v17  ;;  %v858_v57 = vrot.slane %v853_v53, 4  ;;  %v861_v58 = vsel %vm490_vm2, %v853_v53, %v860_v52 }
 0x2d2   : > { %v869_v59 = vperm.slane %v861_v58, %v1579_v28 }
 0x2d3   : > { %v859_v60 = vsel %vm490_vm2, %v858_v57, %v841_v46  ;;  %v870_v61 = vrot.slane %v857_v56, 4  ;;  %v873_v62 = vsel %vm490_vm2, %v857_v56, %v872_v55  ;;  %v1435_v55 = vmov 32.0  }
 0x2d4   : > { %v865_v63 = vperm.slane %v859_v60, %v1579_v28  ;;  %v884_v0 = vrot.slane %v869_v59, 4  ;;  %v881_v1 = vperm.slane %v873_v62, %v1579_v28  ;;  %1342 = vrcp.f32 %v1435_v55 }
 0x2d5   : > { %v871_v2 = vsel %vm490_vm2, %v870_v61, %v845_v49 }
 0x2d6   : > { %v877_v4 = vperm.slane %v871_v2, %v1579_v28  ;;  %v882_v5 = vrot.slane %v865_v63, 4  ;;  %v885_v6 = vsel %vm490_vm2, 0.0, %v884_v0  ;;  %v888_v7 = vrot.slane %v881_v1, 4 }
 0x2d7   : > { %v890_v8 = vsel %vm490_vm2, %v884_v0, %v865_v63  ;;  %v895_v9 = vrot.slane %v885_v6, 4 }
 0x2d8   : > { %v883_v10 = vsel %vm490_vm2, 0.0, %v882_v5  ;;  %v886_v11 = vrot.slane %v877_v4, 4  ;;  %v889_v12 = vsel %vm490_vm2, 0.0, %v888_v7  ;;  %v894_v13 = vperm.slane %v890_v8, %v1571_v17 }
 0x2d9   : > { %v896_v14 = vsel %vm490_vm2, %v895_v9, %v883_v10  ;;  %v901_v15 = vsel %vm490_vm2, %v888_v7, %v877_v4  ;;  %v906_v16 = vrot.slane %v889_v12, 4  ;;  %v1324_v12 = vld [vmem:[%s1767_s6] ss:$0 sm:$0xff] }
 0x2da   : > { %v887_v18 = vsel %vm490_vm2, 0.0, %v886_v11  ;;  %v900_v19 = vperm.slane %v896_v14, %v1571_v17  ;;  %v905_v20 = vperm.slane %v901_v15, %v1571_v17  ;;  %v914_v21 = vrot.slane %v894_v13, 4  ;;  %v1343_v56 = vpop.eup %1342  ;;  %v1325_v15 = vld [vmem:[%s1768_s7] ss:$0 sm:$0xff] }
 0x2db   : > { %v907_v22 = vsel %vm490_vm2, %v906_v16, %v887_v18  ;;  %v998_v57 = vmul.f32 32.0, %v1343_v56  ;;  %vm1002_vm9 = vweird.f32 %v1343_v56 }
 0x2dc   : > { %v911_v23 = vperm.slane %v907_v22, %v1571_v17  ;;  %v915_v24 = vsel %vm490_vm2, %v900_v19, %v914_v21  ;;  %v926_v25 = vrot.slane %v905_v20, 4  ;;  %v912_v26 = vrot.slane %v900_v19, 4 }
 0x2dd   : > { %v923_v27 = vperm.slane %v915_v24, %v1579_v28  ;;  %v999_v58 = vsub.f32 1.0, %v998_v57 }
 0x2de   : > { %v927_v29 = vsel %vm490_vm2, %v911_v23, %v926_v25  ;;  %v913_v30 = vsel %vm490_vm2, %v912_v26, %v894_v13  ;;  %v924_v31 = vrot.slane %v911_v23, 4 }
 0x2df   : > { %v935_v32 = vperm.slane %v927_v29, %v1579_v28  ;;  %v942_v33 = vrot.slane %v923_v27, 4  ;;  %v919_v34 = vperm.slane %v913_v30, %v1579_v28  ;;  %v1000_v59 = vmul.f32 %v1343_v56, %v999_v58 }
 0x2e0   : > { %v925_v35 = vsel %vm490_vm2, %v924_v31, %v905_v20 }
 0x2e1   : > { %v943_v17 = vsel %vm490_vm2, %v935_v32, %v942_v33  ;;  %v940_v36 = vrot.slane %v935_v32, 4  ;;  %v931_v37 = vperm.slane %v925_v35, %v1579_v28  ;;  %v938_v38 = vrot.slane %v919_v34, 4  ;;  %v1257_v28 = vld [vmem:[%s1766_s5] sm:$0xff] }
 0x2e2   : > { %953 = vrot.lane.b32.xlu0 %v943_v17, %s1432_s24  ;;  %988 = vmatpush.bf16.msra.mxu2 %v1257_v28  ;;  %v1001_v60 = vadd.f32 %v1343_v56, %v1000_v59  ;;  %s1360_s24 = sshra.s32 %s1059_s0, 4  ;;  %s1361_s24 = int_to_ptr.hbm [resolvable:$true] %s1360_s24 }
 0x2e3   : > { %v941_v39 = vsel %vm490_vm2, %v940_v36, %v923_v27  ;;  %v936_v40 = vrot.slane %v931_v37, 4  ;;  %v939_v41 = vsel %vm490_vm2, %v931_v37, %v938_v38  ;;  %s1362_s26 = scalar_lea.hbm %s1361_s24, 8  ;;  %p1367_p1 = scmp.lt.s32.totalorder %s1361_s24, %s1769_s8 }
 0x2e4   : > { %949 = vrot.lane.b32.xlu1 %v941_v39, %s1433_s29  ;;  %945 = vrot.lane.b32.xlu2 %v939_v41, %s1434_s15  ;;  %v1003_v61 = vsel %vm1002_vm9, %v1343_v56, %v1001_v60  ;;  %p1363_p12 = scmp.ne.s32.totalorder %s1361_s24, %s1362_s26  ;;  %p1368_p2 = scmp.lt.s32.totalorder %s1366_s27, %s1362_s26 }
 0x2e5   : > { %v937_v42 = vsel %vm490_vm2, %v936_v40, %v919_v34 }
 0x2e6   : > { %p1364_p13 = pnand %p1363_p12, %p1526_p4  ;;  %p1369_p3 = por %p1368_p2, %p1367_p1 }
 0x2e8   : > { %p1365_p0 = pneg %p1364_p13 }
 0x2ea   : > { %p1370_p5 = pnand %p1369_p3, %p1365_p0 }
 0x33e   : > { %v946_v44 = vpop.permute.xlu2 %945 }
 0x33f   : > { %v956_v45 = vsel %vm608_vm3, %v937_v42, %v946_v44 }
 0x354   : > { %v954_v47 = vpop.permute.xlu0 %953 }
 0x356   : > { %v950_v46 = vpop.permute.xlu1 %949 }
 0x357   : > { %v958_v48 = vsel %vm957_vm7, %v956_v45, %v950_v46 }
 0x358   : > { %v960_v49 = vsel %vm959_vm8, %v958_v48, %v954_v47 }
 0x359   : > { %v961_v50 = vpack.c.bf16 %v960_v49, %v960_v49 }
 0x35b   : > { %1247 = vmatmul.msk.bf16.vlgmr.msra.gmra.mxu2 %vm462_vm0, %v961_v50 }
 0x3de   : > { %v990_v51 = vpop.f32.mrf.mxu2 }
 0x3df   : > { %v991_v52 = vadd.f32 %v990_v51, %v1556_v3 }
 0x3e1   : > { %v994_v53 = vsel %vm462_vm0, %v991_v52, 0.0 }
 0x3e2   : > { %995 = vadd.xlane.f32.xlu2 %v994_v53 }
 0x3e6   : > { %v992_v54 = vpop.f32.mrf.mxu2 }
 0x455   : > { %v996_v62 = vpop.xlane.xlu2 %995 }
 0x456   : > { %v1004_v63 = vmul.f32 %v1003_v61, %v996_v62 }
 0x458   : > { %v1005_v0 = vsub.f32 %v991_v52, %v1004_v63 }
 0x45a   : > { %v1006_v1 = vmul.f32 %v1005_v0, %v1005_v0 }
 0x45c   : > { %v1007_v3 = vsel %vm462_vm0, %v1006_v1, 0.0 }
 0x45d   : > { %1008 = vadd.xlane.f32.xlu1 %v1007_v3 }
 0x4d0   : > { %v1009_v2 = vpop.xlane.xlu1 %1008 }
 0x4d1   : > { %v1010_v4 = vmul.f32 %v1009_v2, %v1003_v61 }
 0x4d3   : > { %v1011_v5 = vadd.f32 1e-05, %v1010_v4 }
 0x4d5   : > { %1344 = vrsqrt.f32 %v1011_v5  ;;  %vm1018_vm11 = vweird.f32 %v1011_v5 }
 0x4db   : > { %v1345_v6 = vpop.eup %1344 }
 0x4dc   : > { %v1013_v7 = vmul.f32 %v1345_v6, %v1011_v5  ;;  %vm1019_vm10 = vweird.f32 %v1345_v6 }
 0x4dd   : > { %vm1020_vm12 = vmor %vm1018_vm11, %vm1019_vm10 }
 0x4de   : > { %v1014_v8 = vmul.f32 %v1345_v6, %v1013_v7 }
 0x4e0   : > { %v1015_v9 = vmul.f32 0.5, %v1014_v8 }
 0x4e2   : > { %v1016_v10 = vsub.f32 1.5, %v1015_v9 }
 0x4e4   : > { %v1017_v11 = vmul.f32 %v1345_v6, %v1016_v10 }
 0x4e6   : > { %v1021_v13 = vsel %vm1020_vm12, %v1345_v6, %v1017_v11 }
 0x4e7   : > { %v1022_v14 = vmul.f32 %v1021_v13, %v1005_v0 }
 0x4e9   : > { %v1027_v16 = vmul.f32 %v1324_v12, %v1022_v14 }
 0x4eb   : > { %v1032_v18 = vadd.f32 %v1325_v15, %v1027_v16 }
 0x4ed   : > { %1033 = vst.msk [vmem:[%s399_s23] sm:$0xff] %vm462_vm0, %v1032_v18 }
 0x4ee   : > { %1373 = shalt.err (!%p1370_p5)
}
 0x4ef   : > { %1259 = dma.vmem_to_hbm [thread:$0]  (%p1526_p4), %s1057_s12, 128, %s1059_s0, %s1035_s28  }
 0x4f0 PF: > { %p1265_p6 = scmp.ge.s32.totalorder %s1424_s14, 2  ;;  %s1073_s25 = sand.u32 1, %s1404_s30  }
 0x4f1   : > { %s1074_s20 = scalar_lea.sflag [#allocation3], %s1073_s25 }
 0x4f2   : > { %p1262_p7 = pnand %p1265_p6, %p1533_p8 }
 0x4f4   : > { %p1263_p9 = pneg %p1262_p7 }
 0x4f6   : > { %1399 = dma.done.wait (%p1263_p9), %s1074_s20, 128  }
 0x4f7   : > { %1401 = vsyncadd (%p1263_p9), %s1074_s20, 4294967168  ;;  %s23_s14 = sadd.s32 1, %s1424_s14   ;;  %s1777_s30 = smov %s1408_s10 }
 0x4f8   : > { %p20_p10 = scmp.ge.s32.totalorder %s23_s14, 4   ;;  %s1778_s10 = smov %s1412_s11 }
 0x4f9   : > { %s1779_s11 = smov %s1539_s22  ;;  %s1780_s12 = smov %s1420_s13 }
 0x4fa   : > { %s1781_s13 = smov %s1783_s17  ;;  %22 = sbr.rel (!%p20_p10) target bundleno = 6 (0x6), region = 108 }
 0x4ff   :  { %1091 = vsyncpa [#allocation3], 1 }
 0x500   :  { %1093 = vsyncpa [#allocation3 + $0x1], 1 }

</bundles_post_ra>
